<compile_context>
chip_gen: v6e
topology: v6e:2x2x1
jax: 0.10.0
libtpu: 0.0.40
codegen_flags: <defaults>
</compile_context>

<pallas_src>
import jax
import jax.numpy as jnp
from jax.experimental import pallas as pl
from jax.experimental.pallas import tpu as pltpu


# ---------------------------------------------------------------------------
# Kernel
# ---------------------------------------------------------------------------
def _fused_kernel(x_ref, y_ref, o_ref):
    # x_ref, y_ref: (2, rt, C) row slabs of x / y.
    # o_ref: (4, rt, C); slabs 0..3 are out[0,:D], out[0,D:], out[1,:D], out[1,D:].
    tx0 = jnp.tanh(x_ref[0])
    tx1 = jnp.tanh(x_ref[1])
    ty0 = jnp.tanh(y_ref[0])
    ty1 = jnp.tanh(y_ref[1])
    left = tx0 + ty0           # tanh(x)[0] + tanh(y)[0]  (broadcast over the left half)
    right = tx1 + ty1          # tanh(x)[1] + tanh(y)[1]  (broadcast over the right half)
    o_ref[0] = tx0 + left      # out[0, :D]
    o_ref[1] = ty0 + right     # out[0, D:]
    o_ref[2] = tx1 + left      # out[1, :D]
    o_ref[3] = ty1 + right     # out[1, D:]


# ---------------------------------------------------------------------------
# Layout / tiling selection
# ---------------------------------------------------------------------------
_TARGET_BLOCK_ELEMS = 64 * 1024   # rt*C elems per row-slab per grid step (~2 MiB block set, f32)


def _choose_layout(D, itemsize, block_elems):
    """Factor each D-length row as (R, C) with R*C == D and pick a sublane tile rt.

    Returns (R, C, rt) with rt dividing R.  The Pallas block's last two dims are
    (rt, C): C always equals the full last dim of the reshaped array, and rt is
    either a multiple of the sublane granule or equal to R, so the (8, 128)
    block constraint is always satisfied."""
    sub = 8 * max(1, 4 // max(1, itemsize))      # 8 for f32, 16 for bf16, ...
    C = None
    # Prefer the largest lane width (multiple of 128) that still leaves R >= sub
    # rows, so every vreg is fully sublane dense.
    for cand in (2048, 1024, 512, 256, 128):
        if D % cand == 0 and (D // cand) >= sub:
            C = cand
            break
    if C is None:
        for cand in (2048, 1024, 512, 256, 128):
            if D % cand == 0:
                C = cand
                break
    if C is None:
        # D not a multiple of 128: one short row (correct, just not dense).
        return 1, D, 1
    R = D // C
    rt_cap = max(sub, (block_elems // C) // sub * sub)
    if R <= rt_cap:
        return R, C, R                           # whole problem in one grid step
    rt = R                                       # fallback: single (large) step
    t = min(rt_cap, (R // sub) * sub)
    while t >= sub:
        if R % t == 0:
            rt = t
            break
        t -= sub
    return R, C, rt


# ---------------------------------------------------------------------------
# Wrapper
# ---------------------------------------------------------------------------
def model_forward(x, y, *, block_elems=_TARGET_BLOCK_ELEMS):
    # View glue (metadata only, no data movement).
    xf = x.reshape(x.shape[0], -1)
    yf = y.reshape(y.shape[0], -1)
    B, Dx = xf.shape
    By, Dy = yf.shape
    if B != By:
        raise ValueError("torch.cat(dim=1) requires x.shape[0] == y.shape[0]")
    N = Dx + Dy
    # Broadcast validity of `v2 + x.flat + y.flat` in the original module:
    # numel(x) == numel(y) == Dx + Dy  =>  B == 2 and Dx == Dy.
    if B * Dx != N or B * Dy != N:
        raise ValueError(
            "Model.forward broadcast requires x.numel() == y.numel() == Dx + Dy "
            f"(i.e. batch == 2 and equal per-row sizes); got x={x.shape}, y={y.shape}")
    D = Dx
    dtype = jnp.result_type(xf.dtype, yf.dtype)
    xf = xf.astype(dtype)
    yf = yf.astype(dtype)

    R, C, rt = _choose_layout(D, jnp.dtype(dtype).itemsize, block_elems)
    x3 = xf.reshape(2, R, C)          # metadata-only views of the same bytes
    y3 = yf.reshape(2, R, C)

    out = pl.pallas_call(
        _fused_kernel,
        out_shape=jax.ShapeDtypeStruct((4, R, C), dtype),
        grid_spec=pltpu.PrefetchScalarGridSpec(
            num_scalar_prefetch=0,
            grid=(R // rt,),
            in_specs=[
                pl.BlockSpec((2, rt, C), lambda j: (0, j, 0)),
                pl.BlockSpec((2, rt, C), lambda j: (0, j, 0)),
            ],
            out_specs=pl.BlockSpec((4, rt, C), lambda j: (0, j, 0)),
        ),
        compiler_params=pltpu.CompilerParams(
            dimension_semantics=("parallel",),
            vmem_limit_bytes=32 * 1024 * 1024),
    )(x3, y3)
    # (4, R, C) slabs are exactly L0, R0, L1, R1 in memory order -> (2, 2D) view.
    return out.reshape(B, 2 * D)


def reference_forward(x, y):
    xf = x.reshape(x.shape[0], -1)
    yf = y.reshape(y.shape[0], -1)
    v1 = jnp.concatenate([xf, yf], axis=1)
    return jnp.tanh(v1) + jnp.tanh(x.reshape(-1)) + jnp.tanh(y.reshape(-1))


if __name__ == "__main__":
    key = jax.random.PRNGKey(0)
    k1, k2, k3, k4, k5, k6 = jax.random.split(key, 6)
    B = 2

    # Case 1: module-scale small shapes (x viewed from 3-D); D=64 is not a
    # multiple of 128, exercising the degenerate (R=1, C=D) single-step layout.
    x = jax.random.normal(k1, (B, 4, 16), dtype=jnp.float32)
    y = jax.random.normal(k2, (B, 64), dtype=jnp.float32)
    out = model_forward(x, y)
    jax.block_until_ready(out)
    ref = reference_forward(x, y)
    assert out.shape == (B, 128)
    assert jnp.allclose(out, ref, atol=1e-5, rtol=1e-5)

    # Case 2: D=4096 -> dense (R=8, C=512) slabs, fully sublane/lane-dense
    # blocks, single grid step.
    D2 = 4096
    x2 = jax.random.normal(k3, (B, D2), dtype=jnp.float32)
    y2 = jax.random.normal(k4, (B, D2), dtype=jnp.float32)
    out2 = model_forward(x2, y2)
    jax.block_until_ready(out2)
    ref2 = reference_forward(x2, y2)
    assert out2.shape == (B, 2 * D2)
    assert jnp.allclose(out2, ref2, atol=1e-5, rtol=1e-5)

    # Case 3: small per-step block budget forces a 4-step pipelined grid
    # (C=2048, R=32, rt=8) to exercise the multi-step "parallel" path.
    D3 = 65536
    x3 = jax.random.normal(k5, (B, D3), dtype=jnp.float32)
    y3 = jax.random.normal(k6, (B, D3), dtype=jnp.float32)
    out3 = model_forward(x3, y3, block_elems=16 * 1024)
    jax.block_until_ready(out3)
    ref3 = reference_forward(x3, y3)
    assert out3.shape == (B, 2 * D3)
    assert jnp.allclose(out3, ref3, atol=1e-5, rtol=1e-5)

    print("KERNEL_OK")
</pallas_src>

<mosaic_0001>
module attributes {stable_mosaic.version = 11 : i64} {
  func.func @_fused_kernel(%arg0: i32, %arg1: memref<2x1x64xf32, #tpu.memory_space<vmem>>, %arg2: memref<2x1x64xf32, #tpu.memory_space<vmem>>, %arg3: memref<4x1x64xf32, #tpu.memory_space<vmem>>) attributes {dimension_semantics = [#tpu.dimension_semantics<parallel>], iteration_bounds = array<i64: 1>, scalar_prefetch = 0 : i64, scratch_operands = 0 : i64, tpu.core_type = #tpu.core_type<tc>, window_params = [{transform_indices = @transform_0, window_bounds = array<i64: 2, 1, 64>}, {transform_indices = @transform_1, window_bounds = array<i64: 2, 1, 64>}, {transform_indices = @transform_2, window_bounds = array<i64: 4, 1, 64>}]} {
    %c0 = arith.constant 0 : index
    %c0_0 = arith.constant 0 : index
    %c0_1 = arith.constant 0 : index
    %0 = vector.load %arg1[%c0, %c0_0, %c0_1] : memref<2x1x64xf32, #tpu.memory_space<vmem>>, vector<1x1x64xf32>
    %1 = vector.shape_cast %0 : vector<1x1x64xf32> to vector<1x64xf32>
    %2 = math.tanh %1 : vector<1x64xf32>
    %c1 = arith.constant 1 : index
    %c0_2 = arith.constant 0 : index
    %c0_3 = arith.constant 0 : index
    %3 = vector.load %arg1[%c1, %c0_2, %c0_3] : memref<2x1x64xf32, #tpu.memory_space<vmem>>, vector<1x1x64xf32>
    %4 = vector.shape_cast %3 : vector<1x1x64xf32> to vector<1x64xf32>
    %5 = math.tanh %4 : vector<1x64xf32>
    %c0_4 = arith.constant 0 : index
    %c0_5 = arith.constant 0 : index
    %c0_6 = arith.constant 0 : index
    %6 = vector.load %arg2[%c0_4, %c0_5, %c0_6] : memref<2x1x64xf32, #tpu.memory_space<vmem>>, vector<1x1x64xf32>
    %7 = vector.shape_cast %6 : vector<1x1x64xf32> to vector<1x64xf32>
    %8 = math.tanh %7 : vector<1x64xf32>
    %c1_7 = arith.constant 1 : index
    %c0_8 = arith.constant 0 : index
    %c0_9 = arith.constant 0 : index
    %9 = vector.load %arg2[%c1_7, %c0_8, %c0_9] : memref<2x1x64xf32, #tpu.memory_space<vmem>>, vector<1x1x64xf32>
    %10 = vector.shape_cast %9 : vector<1x1x64xf32> to vector<1x64xf32>
    %11 = math.tanh %10 : vector<1x64xf32>
    %12 = arith.addf %2, %8 : vector<1x64xf32>
    %13 = arith.addf %5, %11 : vector<1x64xf32>
    %14 = arith.addf %2, %12 : vector<1x64xf32>
    %c0_10 = arith.constant 0 : index
    %c0_11 = arith.constant 0 : index
    %c0_12 = arith.constant 0 : index
    %15 = vector.load %arg3[%c0_10, %c0_11, %c0_12] : memref<4x1x64xf32, #tpu.memory_space<vmem>>, vector<1x1x64xf32>
    %16 = vector.shape_cast %15 : vector<1x1x64xf32> to vector<1x64xf32>
    %17 = vector.shape_cast %14 : vector<1x64xf32> to vector<1x1x64xf32>
    tpu.vector_store %arg3[%c0_10, %c0_11, %c0_12], %17 {strides = array<i32>} : memref<4x1x64xf32, #tpu.memory_space<vmem>>, vector<1x1x64xf32>,
    %18 = arith.addf %8, %13 : vector<1x64xf32>
    %c1_13 = arith.constant 1 : index
    %c0_14 = arith.constant 0 : index
    %c0_15 = arith.constant 0 : index
    %19 = vector.load %arg3[%c1_13, %c0_14, %c0_15] : memref<4x1x64xf32, #tpu.memory_space<vmem>>, vector<1x1x64xf32>
    %20 = vector.shape_cast %19 : vector<1x1x64xf32> to vector<1x64xf32>
    %21 = vector.shape_cast %18 : vector<1x64xf32> to vector<1x1x64xf32>
    tpu.vector_store %arg3[%c1_13, %c0_14, %c0_15], %21 {strides = array<i32>} : memref<4x1x64xf32, #tpu.memory_space<vmem>>, vector<1x1x64xf32>,
    %22 = arith.addf %5, %12 : vector<1x64xf32>
    %c2 = arith.constant 2 : index
    %c0_16 = arith.constant 0 : index
    %c0_17 = arith.constant 0 : index
    %23 = vector.load %arg3[%c2, %c0_16, %c0_17] : memref<4x1x64xf32, #tpu.memory_space<vmem>>, vector<1x1x64xf32>
    %24 = vector.shape_cast %23 : vector<1x1x64xf32> to vector<1x64xf32>
    %25 = vector.shape_cast %22 : vector<1x64xf32> to vector<1x1x64xf32>
    tpu.vector_store %arg3[%c2, %c0_16, %c0_17], %25 {strides = array<i32>} : memref<4x1x64xf32, #tpu.memory_space<vmem>>, vector<1x1x64xf32>,
    %26 = arith.addf %11, %13 : vector<1x64xf32>
    %c3 = arith.constant 3 : index
    %c0_18 = arith.constant 0 : index
    %c0_19 = arith.constant 0 : index
    %27 = vector.load %arg3[%c3, %c0_18, %c0_19] : memref<4x1x64xf32, #tpu.memory_space<vmem>>, vector<1x1x64xf32>
    %28 = vector.shape_cast %27 : vector<1x1x64xf32> to vector<1x64xf32>
    %29 = vector.shape_cast %26 : vector<1x64xf32> to vector<1x1x64xf32>
    tpu.vector_store %arg3[%c3, %c0_18, %c0_19], %29 {strides = array<i32>} : memref<4x1x64xf32, #tpu.memory_space<vmem>>, vector<1x1x64xf32>,
    return
  }
  func.func @transform_0(%arg0: i32) -> (i32, i32, i32) {
    %c0_i32 = arith.constant 0 : i32
    %c0_i32_0 = arith.constant 0 : i32
    %c0_i32_1 = arith.constant 0 : i32
    return %c0_i32, %arg0, %c0_i32_0 : i32, i32, i32
  }
  func.func @transform_1(%arg0: i32) -> (i32, i32, i32) {
    %c0_i32 = arith.constant 0 : i32
    %c0_i32_0 = arith.constant 0 : i32
    %c0_i32_1 = arith.constant 0 : i32
    return %c0_i32, %arg0, %c0_i32_0 : i32, i32, i32
  }
  func.func @transform_2(%arg0: i32) -> (i32, i32, i32) {
    %c0_i32 = arith.constant 0 : i32
    %c0_i32_0 = arith.constant 0 : i32
    %c0_i32_1 = arith.constant 0 : i32
    return %c0_i32, %arg0, %c0_i32_0 : i32, i32, i32
  }
}

</mosaic_0001>

<bundles_post_ra>
// kernel: tpu_custom_call.1
= control target key start
LH: loop header
LB: loop body
LE: loop exit
PB: predicated region body
PF: predicated region fallthrough
CT: control target
= control target key end

     0   :  { %7 = vsyncpa [#allocation3], 0  ;;  %s199_s0 = inlined_call_operand.hbm [shape: f32[2,1,64], index: 0, kind: input, shape index: {}]   ;;  %s200_s1 = inlined_call_operand.hbm [shape: f32[2,1,64], index: 1, kind: input, shape index: {}]   ;;  %s201_s2 = inlined_call_operand.hbm [shape: f32[4,1,64], index: 2, kind: output, shape index: {}]  }
   0x1   :  { %8 = vsyncpa [#allocation6], 0 }
   0x2   :  { %9 = vsyncpa [#allocation4], 0  ;;  %s161_s9 = smov [#allocation2]  }
   0x3   :  { %s15_s10 = sshll.u32 %s161_s9, 4  ;;  %s16_s10 = int_to_ptr.vmem [resolvable:$true] %s15_s10 }
   0x4   :  { %s103_s11 = scalar_lea.vmem %s16_s10, 32  ;;  %p108_p1 = scmp.lt.s32.totalorder %s16_s10, %s16_s10 }
   0x5   :  { %p104_p0 = scmp.ne.s32.totalorder %s16_s10, %s103_s11  ;;  %p109_p2 = scmp.lt.s32.totalorder %s103_s11, %s103_s11 }
   0x7   :  { %p110_p3 = por %p109_p2, %p108_p1 }
   0x9   :  { %p111_p4 = pnand %p110_p3, %p104_p0 }
   0xb   :  { %114 = shalt.err (!%p111_p4)
}
   0xc   :  { %s162_s12 = smov 16   ;;  %s163_s13 = smov 1  }
   0xd   :  { %21 = dma.hbm_to_vmem [thread:$0]  %s199_s0, 32, %s16_s10, [#allocation3], %s162_s12, %s162_s12, %s163_s13  }
   0xe   :  { %s164_s16 = smov [#allocation5]  }
   0xf   :  { %s27_s17 = sshll.u32 %s164_s16, 4  ;;  %s28_s17 = int_to_ptr.vmem [resolvable:$true] %s27_s17 }
  0x10   :  { %s123_s18 = scalar_lea.vmem %s28_s17, 32  ;;  %p128_p6 = scmp.lt.s32.totalorder %s28_s17, %s28_s17 }
  0x11   :  { %p124_p5 = scmp.ne.s32.totalorder %s28_s17, %s123_s18  ;;  %p129_p7 = scmp.lt.s32.totalorder %s123_s18, %s123_s18 }
  0x13   :  { %p130_p8 = por %p129_p7, %p128_p6 }
  0x15   :  { %p131_p9 = pnand %p130_p8, %p124_p5 }
  0x17   :  { %134 = shalt.err (!%p131_p9)
}
  0x18   :  { %33 = dma.hbm_to_vmem [thread:$0]  %s200_s1, 32, %s28_s17, [#allocation6], %s162_s12, %s162_s12, %s163_s13  }
  0x19   :  { %155 = dma.done.wait [#allocation3], 32  }
  0x1a   :  { %156 = vsyncadd [#allocation3], 4294967264 }
  0x1b   :  { %157 = dma.done.wait [#allocation6], 32  }
  0x1c   :  { %158 = vsyncadd [#allocation6], 4294967264  ;;  %v40_v0 = vld [vmem:[#allocation2] sm:$0x1]  ;;  %v45_v1 = vld [vmem:[#allocation5] sm:$0x1] }
  0x1d   :  { %v43_v2 = vld [vmem:[#allocation2 + $0x1] sm:$0x1]  ;;  %87 = vtanh.f32 %v40_v0  ;;  %v48_v3 = vld [vmem:[#allocation5 + $0x1] sm:$0x1]  ;;  %vm53_vm0 = vcmask 516096   ;;  %s165_s0 = smov [#allocation7]  }
  0x1e   :  { %89 = vtanh.f32 %v45_v1  ;;  %s69_s1 = sshll.u32 %s165_s0, 4  ;;  %s70_s1 = int_to_ptr.vmem [resolvable:$true] %s69_s1 }
  0x1f   :  { %91 = vtanh.f32 %v43_v2  ;;  %s135_s21 = scalar_lea.vmem %s70_s1, 64  ;;  %p140_p11 = scmp.lt.s32.totalorder %s70_s1, %s70_s1 }
  0x20   :  { %93 = vtanh.f32 %v48_v3  ;;  %p136_p10 = scmp.ne.s32.totalorder %s70_s1, %s135_s21  ;;  %p141_p12 = scmp.lt.s32.totalorder %s135_s21, %s135_s21 }
  0x22   :  { %p142_p13 = por %p141_p12, %p140_p11 }
  0x24   :  { %p143_p0 = pnand %p142_p13, %p136_p10 }
  0x2a   :  { %v88_v4 = vpop.eup %87 }
  0x2b   :  { %v90_v5 = vpop.eup %89 }
  0x2c   :  { %v92_v6 = vpop.eup %91  ;;  %v50_v7 = vadd.f32 %v90_v5, %v88_v4 }
  0x2d   :  { %v94_v8 = vpop.eup %93 }
  0x2e   :  { %v52_v9 = vadd.f32 %v88_v4, %v50_v7  ;;  %v51_v10 = vadd.f32 %v94_v8, %v92_v6  ;;  %v58_v11 = vadd.f32 %v92_v6, %v50_v7 }
  0x30   :  { %54 = vst.msk [vmem:[#allocation7] sm:$0x1] %vm53_vm0, %v52_v9  ;;  %v55_v12 = vadd.f32 %v90_v5, %v51_v10  ;;  %60 = vst.msk [vmem:[#allocation7 + $0x2] sm:$0x1] %vm53_vm0, %v58_v11  ;;  %v61_v13 = vadd.f32 %v94_v8, %v51_v10 }
  0x32   :  { %57 = vst.msk [vmem:[#allocation7 + $0x1] sm:$0x1] %vm53_vm0, %v55_v12  ;;  %63 = vst.msk [vmem:[#allocation7 + $0x3] sm:$0x1] %vm53_vm0, %v61_v13 }
  0x33   :  { %146 = shalt.err (!%p143_p0)
}
  0x34   :  { %75 = dma.vmem_to_hbm [thread:$0]  %s70_s1, 64, %s201_s2, [#allocation4], %s162_s12, %s162_s12, %s163_s13  }
  0x35   :  { %159 = dma.done.wait [#allocation4], 64  }
  0x36   :  { %160 = vsyncadd [#allocation4], 4294967232 }
  0x37   :  { %79 = vsyncpa [#allocation3], 1 }
  0x38   :  { %80 = vsyncpa [#allocation6], 1 }
  0x39   :  { %81 = vsyncpa [#allocation4], 1 }

</bundles_post_ra>
